<compile_context>
chip_gen: v6e
topology: v6e:2x2x1
jax: 0.10.0
libtpu: 0.0.40
codegen_flags: <defaults>
</compile_context>

<pallas_src>
import functools

import jax
import jax.numpy as jnp
from jax.experimental import pallas as pl
from jax.experimental.pallas import tpu as pltpu


def _round_up(x, m):
    return (x + m - 1) // m * m


def _cdiv(a, b):
    return (a + b - 1) // b


def _pick_tile(dim, max_tile, align):
    """Smallest aligned tile that keeps #blocks == cdiv(dim, max_tile).

    Minimizes padding waste for awkward shapes (B=300, max=512 -> 304 rather
    than 512) while never growing the block count.
    """
    nb = max(1, _cdiv(dim, max_tile))
    return _round_up(_cdiv(dim, nb), align)


def _apply_act(acc, activation):
    if activation == "sigmoid":
        return jax.nn.sigmoid(acc)
    return jnp.maximum(acc, 0.0)


def _fc_kernel_fused(x_ref, w_ref, b_ref, o_ref, *, activation):
    """K fits in one tile: matmul + bias + activation, output written once."""
    acc = jnp.dot(x_ref[...], w_ref[...], preferred_element_type=jnp.float32)
    acc = acc + b_ref[...].astype(jnp.float32)
    o_ref[...] = _apply_act(acc, activation).astype(o_ref.dtype)


def _fc_kernel_acc(x_ref, w_ref, b_ref, o_ref, acc_ref, *, activation):
    """Gridded-K path: f32 accumulator resident across the K axis."""
    k = pl.program_id(2)

    @pl.when(k == 0)
    def _():
        # Seed the accumulator with the broadcast bias -> no bias add in the
        # epilogue (one fewer full-tile VPU add + acc read per output tile).
        acc_ref[...] = jnp.broadcast_to(
            b_ref[...].astype(jnp.float32), acc_ref.shape)

    acc_ref[...] += jnp.dot(
        x_ref[...], w_ref[...], preferred_element_type=jnp.float32)

    @pl.when(k == pl.num_programs(2) - 1)
    def _():
        o_ref[...] = _apply_act(acc_ref[...], activation).astype(o_ref.dtype)


def prepare_fc_params(weight, bias, *, tn_max=512, tk_max=1024,
                      k_collapse=2048, compute_dtype=None):
    """One-time param prep (hoisted out of the per-call path).

    weight: [Dout, Din] (nn.Linear layout), bias: [Dout].
    Returns (weight_t_padded [Kp, Np], bias_padded [1, Np], meta).
    """
    Dout, Din = weight.shape
    if compute_dtype is not None:
        weight = weight.astype(compute_dtype)

    k_aligned = _round_up(Din, 128)
    if k_aligned <= k_collapse:
        tk = k_aligned                      # collapse the K grid axis entirely
    else:
        tk = _pick_tile(Din, tk_max, 128)
    tn = _pick_tile(Dout, tn_max, 128)

    Kp = _round_up(Din, tk)
    Np = _round_up(Dout, tn)

    wt = weight.T                           # [Din, Dout]
    if (Kp, Np) != (Din, Dout):
        wt = jnp.pad(wt, ((0, Kp - Din), (0, Np - Dout)))
    bp = bias if Np == Dout else jnp.pad(bias, (0, Np - Dout))
    bp = bp.reshape(1, Np).astype(jnp.float32)

    meta = dict(Din=Din, Dout=Dout, Kp=Kp, Np=Np, tk=tk, tn=tn)
    return wt, bp, meta


def fully_connected_layer(x, weight_t_p, bias_p, meta, task="None",
                          *, tm_max=512, compute_dtype=None):
    """y = act(x @ W^T + b) with pre-prepared (padded) params."""
    B, Din = x.shape
    assert Din == meta["Din"], "x feature dim does not match prepared params"
    Kp, Np, tk, tn = meta["Kp"], meta["Np"], meta["tk"], meta["tn"]
    Dout = meta["Dout"]

    if compute_dtype is not None:
        x = x.astype(compute_dtype)
    sublane = 16 if jnp.dtype(x.dtype).itemsize == 2 else 8

    tm = _pick_tile(B, tm_max, sublane)
    Mp = _round_up(B, tm)
    # v7x has 2 TensorCores: if the parallel (M, N) grid collapsed to a single
    # block, split M so both cores get work (neutral on v5e/v6e, 1 TC).
    if (Mp // tm) * (Np // tn) == 1 and B >= 2 * sublane:
        tm = _round_up(_cdiv(B, 2), sublane)
        Mp = _round_up(B, tm)

    # Only x is padded per call: M to the tile, K with zeros (zero contribution
    # to the accumulation). Padded output rows/cols are sliced off below.
    if (Mp, Kp) != (B, Din):
        x = jnp.pad(x, ((0, Mp - B), (0, Kp - Din)))

    activation = "sigmoid" if task == "cls" else "relu"
    n_k = Kp // tk
    grid_m, grid_n = Mp // tm, Np // tn

    itemsize = jnp.dtype(x.dtype).itemsize
    cost = pl.CostEstimate(
        flops=2 * Mp * Kp * Np,
        transcendentals=(Mp * Np if activation == "sigmoid" else 0),
        bytes_accessed=(Mp * Kp + Kp * Np + Np + Mp * Np) * itemsize,
    )

    # Double-buffered in/out tiles (+ f32 scratch on the gridded-K path).
    footprint = 2 * (tm * tk + tk * tn + tn + tm * tn) * itemsize
    if n_k > 1:
        footprint += tm * tn * 4
    # Explicit limit: above v5e's 16 MiB default, capped for v7x's 64 MiB VMEM.
    vmem_limit = int(min(48 * 1024 * 1024,
                         max(footprint + (4 << 20), 32 * 1024 * 1024)))

    if n_k == 1:
        out = pl.pallas_call(
            functools.partial(_fc_kernel_fused, activation=activation),
            out_shape=jax.ShapeDtypeStruct((Mp, Np), x.dtype),
            grid=(grid_m, grid_n),
            in_specs=[
                pl.BlockSpec((tm, Kp), lambda i, j: (i, 0)),   # x tile
                pl.BlockSpec((Kp, tn), lambda i, j: (0, j)),   # W^T tile
                pl.BlockSpec((1, tn), lambda i, j: (0, j)),    # bias tile
            ],
            out_specs=pl.BlockSpec((tm, tn), lambda i, j: (i, j)),
            compiler_params=pltpu.CompilerParams(
                dimension_semantics=("parallel", "parallel"),
                vmem_limit_bytes=vmem_limit,
            ),
            cost_estimate=cost,
        )(x, weight_t_p, bias_p)
    else:
        out = pl.pallas_call(
            functools.partial(_fc_kernel_acc, activation=activation),
            out_shape=jax.ShapeDtypeStruct((Mp, Np), x.dtype),
            grid=(grid_m, grid_n, n_k),
            in_specs=[
                pl.BlockSpec((tm, tk), lambda i, j, k: (i, k)),   # x tile
                pl.BlockSpec((tk, tn), lambda i, j, k: (k, j)),   # W^T tile
                pl.BlockSpec((1, tn), lambda i, j, k: (0, j)),    # bias tile
            ],
            out_specs=pl.BlockSpec((tm, tn), lambda i, j, k: (i, j)),
            scratch_shapes=[pltpu.VMEM((tm, tn), jnp.float32)],
            compiler_params=pltpu.CompilerParams(
                dimension_semantics=("parallel", "parallel", "arbitrary"),
                vmem_limit_bytes=vmem_limit,
            ),
            cost_estimate=cost,
        )(x, weight_t_p, bias_p)

    if (Mp, Np) != (B, Dout):
        out = out[:B, :Dout]
    return out


if __name__ == "__main__":
    key = jax.random.PRNGKey(0)
    k_x, k_w, k_b, k_x2, k_w2, k_b2 = jax.random.split(key, 6)

    # ---- Small problem: collapsed-K fused path (2-D grid, no scratch) ----
    batch, input_dim, output_dim = 8, 32, 16
    bound = 1.0 / jnp.sqrt(input_dim)
    weight = jax.random.uniform(k_w, (output_dim, input_dim),
                                minval=-bound, maxval=bound, dtype=jnp.float32)
    bias = jax.random.uniform(k_b, (output_dim,),
                              minval=-bound, maxval=bound, dtype=jnp.float32)
    x = jax.random.normal(k_x, (batch, input_dim), dtype=jnp.float32)

    wt_p, b_p, meta = prepare_fc_params(weight, bias)   # hoisted, once

    y = jax.block_until_ready(
        fully_connected_layer(x, wt_p, b_p, meta, task="None"))
    y_ref = jnp.maximum(x @ weight.T + bias, 0.0)
    assert y.shape == (batch, output_dim)
    assert jnp.allclose(y, y_ref, atol=1e-5, rtol=1e-5)

    yc = jax.block_until_ready(
        fully_connected_layer(x, wt_p, b_p, meta, task="cls"))
    yc_ref = jax.nn.sigmoid(x @ weight.T + bias)
    assert jnp.allclose(yc, yc_ref, atol=1e-5, rtol=1e-5)

    # ---- Awkward shape: gridded-K accumulator path + padding + M split ----
    batch2, in2, out2 = 24, 300, 40
    bound2 = 1.0 / jnp.sqrt(in2)
    weight2 = jax.random.uniform(k_w2, (out2, in2),
                                 minval=-bound2, maxval=bound2,
                                 dtype=jnp.float32)
    bias2 = jax.random.uniform(k_b2, (out2,),
                               minval=-bound2, maxval=bound2,
                               dtype=jnp.float32)
    x2 = jax.random.normal(k_x2, (batch2, in2), dtype=jnp.float32)

    # Force the multi-step K path with small tiles to exercise the accumulator.
    wt2_p, b2_p, meta2 = prepare_fc_params(weight2, bias2,
                                           tk_max=128, k_collapse=128)
    y2 = jax.block_until_ready(
        fully_connected_layer(x2, wt2_p, b2_p, meta2, task="cls"))
    y2_ref = jax.nn.sigmoid(x2 @ weight2.T + bias2)
    assert y2.shape == (batch2, out2)
    assert jnp.allclose(y2, y2_ref, atol=1e-4, rtol=1e-4)

    print("KERNEL_OK")
</pallas_src>

<mosaic_0001>
module attributes {stable_mosaic.version = 11 : i64} {
  func.func @_fc_kernel_fused(%arg0: i32, %arg1: i32, %arg2: memref<8x128xf32, #tpu.memory_space<vmem>>, %arg3: memref<128x128xf32, #tpu.memory_space<vmem>>, %arg4: memref<1x128xf32, #tpu.memory_space<vmem>>, %arg5: memref<8x128xf32, #tpu.memory_space<vmem>>) attributes {dimension_semantics = [#tpu.dimension_semantics<parallel>, #tpu.dimension_semantics<parallel>], iteration_bounds = array<i64: 1, 1>, scalar_prefetch = 0 : i64, scratch_operands = 0 : i64, tpu.core_type = #tpu.core_type<tc>, window_params = [{transform_indices = @transform_0, window_bounds = array<i64: 8, 128>}, {transform_indices = @transform_1, window_bounds = array<i64: 128, 128>}, {transform_indices = @transform_2, window_bounds = array<i64: 1, 128>}, {transform_indices = @transform_3, window_bounds = array<i64: 8, 128>}]} {
    %c0 = arith.constant 0 : index
    %c0_0 = arith.constant 0 : index
    %0 = vector.load %arg2[%c0, %c0_0] : memref<8x128xf32, #tpu.memory_space<vmem>>, vector<8x128xf32>
    %c0_1 = arith.constant 0 : index
    %c0_2 = arith.constant 0 : index
    %1 = vector.load %arg3[%c0_1, %c0_2] : memref<128x128xf32, #tpu.memory_space<vmem>>, vector<128x128xf32>
    %cst = arith.constant dense<0.000000e+00> : vector<8x128xf32>
    %2 = tpu.matmul %0, %1, %cst {dimension_numbers = #tpu.dot_dimension_numbers<[1], [0], [0], [1], [0, 0, 1, 1], [], []>} : vector<8x128xf32>, vector<128x128xf32>, vector<8x128xf32> -> vector<8x128xf32>
    %c0_3 = arith.constant 0 : index
    %c0_4 = arith.constant 0 : index
    %3 = vector.load %arg4[%c0_3, %c0_4] : memref<1x128xf32, #tpu.memory_space<vmem>>, vector<1x128xf32>
    %4 = vector.broadcast %3 : vector<1x128xf32> to vector<8x128xf32>
    %5 = arith.addf %2, %4 : vector<8x128xf32>
    %cst_5 = arith.constant 0.000000e+00 : f32
    %6 = vector.broadcast %cst_5 : f32 to vector<8x128xf32>
    %7 = arith.maximumf %5, %6 : vector<8x128xf32>
    %c0_6 = arith.constant 0 : index
    %c0_7 = arith.constant 0 : index
    %8 = vector.load %arg5[%c0_6, %c0_7] : memref<8x128xf32, #tpu.memory_space<vmem>>, vector<8x128xf32>
    tpu.vector_store %arg5[%c0_6, %c0_7], %7 {strides = array<i32>} : memref<8x128xf32, #tpu.memory_space<vmem>>, vector<8x128xf32>,
    return
  }
  func.func @transform_0(%arg0: i32, %arg1: i32) -> (i32, i32) {
    %c0_i32 = arith.constant 0 : i32
    %c0_i32_0 = arith.constant 0 : i32
    return %arg0, %c0_i32 : i32, i32
  }
  func.func @transform_1(%arg0: i32, %arg1: i32) -> (i32, i32) {
    %c0_i32 = arith.constant 0 : i32
    %c0_i32_0 = arith.constant 0 : i32
    return %c0_i32, %arg1 : i32, i32
  }
  func.func @transform_2(%arg0: i32, %arg1: i32) -> (i32, i32) {
    %c0_i32 = arith.constant 0 : i32
    %c0_i32_0 = arith.constant 0 : i32
    return %c0_i32, %arg1 : i32, i32
  }
  func.func @transform_3(%arg0: i32, %arg1: i32) -> (i32, i32) {
    %c0_i32 = arith.constant 0 : i32
    return %arg0, %arg1 : i32, i32
  }
}

</mosaic_0001>

<bundles_post_ra>
// kernel: tpu_custom_call.1
= control target key start
LH: loop header
LB: loop body
LE: loop exit
PB: predicated region body
PF: predicated region fallthrough
CT: control target
= control target key end

     0   :  { %8 = vsyncpa [#allocation3], 0  ;;  %s318_s0 = inlined_call_operand.hbm [shape: f32[8,128], index: 0, kind: input, shape index: {}]   ;;  %s319_s1 = inlined_call_operand.hbm [shape: f32[128,128], index: 1, kind: input, shape index: {}]   ;;  %s320_s2 = inlined_call_operand.vmem [shape: f32[1,128], index: 2, kind: input, shape index: {}]   ;;  %s321_s3 = inlined_call_operand.hbm [shape: f32[8,128], index: 3, kind: output, shape index: {}]  }
   0x1   :  { %9 = vsyncpa [#allocation6], 0 }
   0x2   :  { %10 = vsyncpa [#allocation4], 0  ;;  %s279_s12 = smov [#allocation2]   ;;  %s280_s14 = smov [#allocation5]  }
   0x3   :  { %s17_s13 = sshll.u32 %s279_s12, 4  ;;  %s26_s15 = sshll.u32 %s280_s14, 4  ;;  %s18_s13 = int_to_ptr.vmem [resolvable:$true] %s17_s13  ;;  %s27_s15 = int_to_ptr.vmem [resolvable:$true] %s26_s15 }
   0x4   :  { %s221_s16 = scalar_lea.vmem %s18_s13, 128  ;;  %p226_p1 = scmp.lt.s32.totalorder %s18_s13, %s18_s13 }
   0x5   :  { %p222_p0 = scmp.ne.s32.totalorder %s18_s13, %s221_s16  ;;  %p227_p2 = scmp.lt.s32.totalorder %s221_s16, %s221_s16 }
   0x7   :  { %p228_p3 = por %p227_p2, %p226_p1 }
   0x9   :  { %p229_p4 = pnand %p228_p3, %p222_p0 }
   0xb   :  { %232 = shalt.err (!%p229_p4)
}
   0xc   :  { %20 = dma.hbm_to_vmem [thread:$0]  %s318_s0, 128, %s18_s13, [#allocation3]  }
   0xd   :  { %s241_s19 = scalar_lea.vmem %s27_s15, 2048  ;;  %p246_p6 = scmp.lt.s32.totalorder %s27_s15, %s27_s15 }
   0xe   :  { %p242_p5 = scmp.ne.s32.totalorder %s27_s15, %s241_s19  ;;  %p247_p7 = scmp.lt.s32.totalorder %s241_s19, %s241_s19 }
  0x10   :  { %p248_p8 = por %p247_p7, %p246_p6 }
  0x12   :  { %p249_p9 = pnand %p248_p8, %p242_p5 }
  0x14   :  { %252 = shalt.err (!%p249_p9)
}
  0x15   :  { %s281_s20 = smov 128   ;;  %s282_s21 = smov 8  }
  0x16   :  { %32 = dma.hbm_to_vmem [thread:$0]  %s319_s1, 2048, %s27_s15, [#allocation6], %s281_s20, %s281_s20, %s282_s21  }
  0x17   :  { %273 = dma.done.wait [#allocation3], 128  }
  0x18   :  { %274 = vsyncadd [#allocation3], 4294967168 }
  0x19   :  { %275 = dma.done.wait [#allocation6], 2048  }
  0x1a   :  { %276 = vsyncadd [#allocation6], 4294965248  ;;  %v283_v0 = vmov 0.0   ;;  %vm284_vm0 = vmmov 0   ;;  %v57_v1 = vld [vmem:[#allocation5 + $0x78] sm:$0xff]  ;;  %v56_v2 = vld [vmem:[#allocation5 + $0x70] sm:$0xff] }
  0x1b   :  { %171 = vmatprep.subr.mxu0 %v283_v0  ;;  %203 = vmatprep.mubr.msk.f32.mxu0 %vm284_vm0, %v283_v0  ;;  %v55_v3 = vld [vmem:[#allocation5 + $0x68] sm:$0xff]  ;;  %v54_v4 = vld [vmem:[#allocation5 + $0x60] sm:$0xff]  ;;  %v53_v5 = vld [vmem:[#allocation5 + $0x58] sm:$0xff]  ;;  %s285_s24 = smov [#allocation7]  }
  0x1c   :  { %172 = vmatpush3.msra.mxu0 %v57_v1  ;;  %v52_v6 = vld [vmem:[#allocation5 + $0x50] sm:$0xff]  ;;  %v51_v7 = vld [vmem:[#allocation5 + $0x48] sm:$0xff]  ;;  %v50_v8 = vld [vmem:[#allocation5 + $0x40] sm:$0xff]  ;;  %s143_s25 = sshll.u32 %s285_s24, 4  ;;  %s144_s25 = int_to_ptr.vmem [resolvable:$true] %s143_s25 }
  0x1d   :  { %173 = vmatprep.subr.mxu0 %v283_v0  ;;  %v49_v9 = vld [vmem:[#allocation5 + $0x38] sm:$0xff]  ;;  %v48_v10 = vld [vmem:[#allocation5 + $0x30] sm:$0xff]  ;;  %v47_v11 = vld [vmem:[#allocation5 + $0x28] sm:$0xff]  ;;  %s253_s26 = scalar_lea.vmem %s144_s25, 128  ;;  %p258_p11 = scmp.lt.s32.totalorder %s144_s25, %s144_s25 }
  0x1e   :  { %174 = vmatpush3.msra.mxu0 %v56_v2  ;;  %v46_v12 = vld [vmem:[#allocation5 + $0x20] sm:$0xff]  ;;  %v45_v13 = vld [vmem:[#allocation5 + $0x18] sm:$0xff]  ;;  %v44_v14 = vld [vmem:[#allocation5 + $0x10] sm:$0xff]  ;;  %p254_p10 = scmp.ne.s32.totalorder %s144_s25, %s253_s26  ;;  %p259_p12 = scmp.lt.s32.totalorder %s253_s26, %s253_s26 }
  0x1f   :  { %175 = vmatprep.subr.mxu0 %v283_v0  ;;  %v43_v15 = vld [vmem:[#allocation5 + $0x8] sm:$0xff]  ;;  %v42_v16 = vld [vmem:[#allocation5] sm:$0xff]  ;;  %v41_v17 = vld [vmem:[#allocation2] sm:$0xff] }
  0x20   :  { %176 = vmatpush3.msra.mxu0 %v55_v3  ;;  %v153_v18 = vld [vmem:[%s320_s2] ss:$0 sm:$0xff]  ;;  %p260_p13 = por %p259_p12, %p258_p11 }
  0x21   :  { %177 = vmatprep.subr.mxu0 %v283_v0 }
  0x22   :  { %178 = vmatpush3.msra.mxu0 %v54_v4  ;;  %p261_p0 = pnand %p260_p13, %p254_p10 }
  0x23   :  { %179 = vmatprep.subr.mxu0 %v283_v0 }
  0x24   :  { %180 = vmatpush3.msra.mxu0 %v53_v5 }
  0x25   :  { %181 = vmatprep.subr.mxu0 %v283_v0 }
  0x26   :  { %182 = vmatpush3.msra.mxu0 %v52_v6 }
  0x27   :  { %183 = vmatprep.subr.mxu0 %v283_v0 }
  0x28   :  { %184 = vmatpush3.msra.mxu0 %v51_v7 }
  0x29   :  { %185 = vmatprep.subr.mxu0 %v283_v0 }
  0x2a   :  { %186 = vmatpush3.msra.mxu0 %v50_v8 }
  0x2b   :  { %187 = vmatprep.subr.mxu0 %v283_v0 }
  0x2c   :  { %188 = vmatpush3.msra.mxu0 %v49_v9 }
  0x2d   :  { %189 = vmatprep.subr.mxu0 %v283_v0 }
  0x2e   :  { %190 = vmatpush3.msra.mxu0 %v48_v10 }
  0x2f   :  { %191 = vmatprep.subr.mxu0 %v283_v0 }
  0x30   :  { %192 = vmatpush3.msra.mxu0 %v47_v11 }
  0x31   :  { %193 = vmatprep.subr.mxu0 %v283_v0 }
  0x32   :  { %194 = vmatpush3.msra.mxu0 %v46_v12 }
  0x33   :  { %195 = vmatprep.subr.mxu0 %v283_v0 }
  0x34   :  { %196 = vmatpush3.msra.mxu0 %v45_v13 }
  0x35   :  { %197 = vmatprep.subr.mxu0 %v283_v0 }
  0x36   :  { %198 = vmatpush3.msra.mxu0 %v44_v14 }
  0x37   :  { %199 = vmatprep.subr.mxu0 %v283_v0 }
  0x38   :  { %200 = vmatpush3.msra.mxu0 %v43_v15 }
  0x39   :  { %201 = vmatprep.subr.mxu0 %v283_v0 }
  0x3a   :  { %202 = vmatpush3.msra.mxu0 %v42_v16 }
  0x3b   :  { %204 = vmatmul.mubr.f32.vlgmr.msra.gmra.mxu0 %v41_v17 }
  0xfb   :  { %v131_v19 = vpop.f32.mrf.mxu0 }
  0xfc   :  { %v132_v20 = vadd.f32 %v153_v18, %v131_v19 }
  0xfd   :  { %v205_v21 = vpop.f32.mrf.mxu0 }
  0xfe   :  { %v135_v22 = vmax.f32 %v132_v20, 0.0 }
 0x100   :  { %136 = vst [vmem:[#allocation7] sm:$0xff] %v135_v22 }
 0x101   :  { %264 = shalt.err (!%p261_p0)
}
 0x102   :  { %146 = dma.vmem_to_hbm [thread:$0]  %s144_s25, 128, %s321_s3, [#allocation4]  }
 0x103   :  { %277 = dma.done.wait [#allocation4], 128  }
 0x104   :  { %278 = vsyncadd [#allocation4], 4294967168 }
 0x105   :  { %150 = vsyncpa [#allocation3], 1 }
 0x106   :  { %151 = vsyncpa [#allocation6], 1 }
 0x107   :  { %152 = vsyncpa [#allocation4], 1 }

</bundles_post_ra>
